<compile_context>
chip_gen: v7x
topology: tpu7x:2x2x1
jax: 0.10.0
libtpu: 0.0.40
codegen_flags: <defaults>
</compile_context>

<pallas_src>
import functools

import jax
import jax.numpy as jnp
from jax.experimental import pallas as pl
from jax.experimental.pallas import tpu as pltpu


def _round_up(x, m):
    return ((x + m - 1) // m) * m


def _make_joints_sse_kernel(use_target_weight, needs_mask, total_rows, row_tile):
    """Per-block sum-of-squared-error kernel.

    Grid axis 0 runs over row tiles of the flattened (B*K, H*W) heatmaps.
    Each step writes its partial sum to its own (1, 1) SMEM output block.
    """

    def kernel(w_ref, pred_ref, gt_ref, out_ref):
        pred = pred_ref[...].astype(jnp.float32)      # (ROW_TILE, HW)
        gt = gt_ref[...].astype(jnp.float32)          # (ROW_TILE, HW)
        diff = pred - gt
        if use_target_weight:
            w = w_ref[...].astype(jnp.float32)        # (ROW_TILE, 1) -> broadcast over HW
            diff = diff * w
        if needs_mask:
            # Zero out rows that fall past the real (B*K) extent. jnp.where is a
            # select, so garbage/NaN in the padded region cannot leak through.
            row0 = pl.program_id(0) * row_tile
            rows = jax.lax.broadcasted_iota(jnp.int32, diff.shape, 0) + row0
            diff = jnp.where(rows < total_rows, diff, jnp.float32(0.0))
        out_ref[0, 0] = jnp.sum(diff * diff)

    return kernel


@functools.partial(jax.jit, static_argnames=("use_target_weight", "loss_weight"))
def joints_mse_loss(output, target, target_weight,
                    use_target_weight=False, loss_weight=1.0):
    """Pallas implementation of JointsMSELoss.forward.

    output, target: (B, K, H, W) float arrays (NCHW).
    target_weight:  (B, K, 1) float array.
    Returns a float32 scalar.
    """
    B, K, H, W = output.shape
    HW = H * W
    R = B * K

    # Free, contiguous reshapes -- no transpose, no extra HBM traffic.
    pred = output.reshape(R, HW)
    gt = target.reshape(R, HW)
    tw = target_weight.reshape(R, 1)

    # Pick a row tile so each heatmap input buffer is ~2 MiB (or the whole
    # array if smaller), keeping the sublane dim a multiple of 8.
    itemsize = jnp.dtype(output.dtype).itemsize
    bytes_per_row = max(HW * itemsize, 1)
    tile_budget_bytes = 2 * 1024 * 1024
    max_rows_by_bytes = max(8, (tile_budget_bytes // bytes_per_row) // 8 * 8)
    row_tile = min(max_rows_by_bytes, _round_up(R, 8))
    num_blocks = (R + row_tile - 1) // row_tile
    needs_mask = (R % row_tile) != 0

    kernel = _make_joints_sse_kernel(bool(use_target_weight), needs_mask, R, row_tile)

    partials = pl.pallas_call(
        kernel,
        out_shape=jax.ShapeDtypeStruct((num_blocks, 1), jnp.float32),
        grid=(num_blocks,),
        in_specs=[
            pl.BlockSpec((row_tile, 1), lambda i: (i, 0)),    # target_weight rows
            pl.BlockSpec((row_tile, HW), lambda i: (i, 0)),   # pred heatmap rows
            pl.BlockSpec((row_tile, HW), lambda i: (i, 0)),   # gt heatmap rows
        ],
        out_specs=pl.BlockSpec((1, 1), lambda i: (i, 0),
                               memory_space=pltpu.MemorySpace.SMEM),
        compiler_params=pltpu.CompilerParams(
            dimension_semantics=("parallel",),
            vmem_limit_bytes=32 * 1024 * 1024),
    )(tw, pred, gt)

    # sum_j mean_{B,HW}(diff^2) / K * loss_weight
    #   == sum_all(diff^2) * loss_weight / (B * HW * K)
    scale = jnp.float32(float(loss_weight) / float(B * HW * K))
    return jnp.sum(partials) * scale


def _reference_joints_mse_loss(output, target, target_weight,
                               use_target_weight=False, loss_weight=1.0):
    """Pure-JAX reference mirroring the PyTorch loop semantics."""
    B, K, _, _ = output.shape
    pred = output.reshape(B, K, -1).astype(jnp.float32)
    gt = target.reshape(B, K, -1).astype(jnp.float32)
    loss = jnp.float32(0.0)
    for idx in range(K):
        hp = pred[:, idx]
        hg = gt[:, idx]
        if use_target_weight:
            w = target_weight[:, idx].astype(jnp.float32)  # (B, 1)
            hp = hp * w
            hg = hg * w
        loss = loss + jnp.mean((hp - hg) ** 2)
    return loss / K * loss_weight


if __name__ == "__main__":
    key = jax.random.PRNGKey(0)

    ok = True
    # Case 1: evenly tiled rows (B*K multiple of 8). Case 2: ragged rows,
    # exercises the in-kernel row mask (partial final block).
    for (B, K, H, W) in ((2, 4, 16, 16), (2, 5, 16, 16)):
        k1, k2, k3, key = jax.random.split(key, 4)
        output = jax.random.normal(k1, (B, K, H, W), dtype=jnp.float32)
        target = jax.random.normal(k2, (B, K, H, W), dtype=jnp.float32)
        target_weight = jax.random.uniform(k3, (B, K, 1), dtype=jnp.float32)

        for use_tw in (False, True):
            got = joints_mse_loss(output, target, target_weight,
                                  use_target_weight=use_tw, loss_weight=1.0)
            got = jax.block_until_ready(got)
            ref = _reference_joints_mse_loss(output, target, target_weight,
                                             use_target_weight=use_tw,
                                             loss_weight=1.0)
            ok = ok and bool(jnp.allclose(got, ref, rtol=1e-5, atol=1e-5))

    if ok:
        print("KERNEL_OK")
    else:
        print("KERNEL_MISMATCH")
</pallas_src>

<mosaic_0001>
module attributes {stable_mosaic.version = 11 : i64} {
  func.func @kernel(%arg0: i32, %arg1: memref<8x1xf32, #tpu.memory_space<vmem>>, %arg2: memref<8x256xf32, #tpu.memory_space<vmem>>, %arg3: memref<8x256xf32, #tpu.memory_space<vmem>>, %arg4: memref<1x1xf32, #tpu.memory_space<smem>>) attributes {dimension_semantics = [#tpu.dimension_semantics<parallel>], iteration_bounds = array<i64: 1>, scalar_prefetch = 0 : i64, scratch_operands = 0 : i64, tpu.core_type = #tpu.core_type<tc>, window_params = [{transform_indices = @transform_0, window_bounds = array<i64: 8, 1>}, {transform_indices = @transform_1, window_bounds = array<i64: 8, 256>}, {transform_indices = @transform_2, window_bounds = array<i64: 8, 256>}, {transform_indices = @transform_3, window_bounds = array<i64: 1, 1>}]} {
    %c0 = arith.constant 0 : index
    %c0_0 = arith.constant 0 : index
    %0 = vector.load %arg2[%c0, %c0_0] : memref<8x256xf32, #tpu.memory_space<vmem>>, vector<8x256xf32>
    %c0_1 = arith.constant 0 : index
    %c0_2 = arith.constant 0 : index
    %1 = vector.load %arg3[%c0_1, %c0_2] : memref<8x256xf32, #tpu.memory_space<vmem>>, vector<8x256xf32>
    %2 = arith.subf %0, %1 : vector<8x256xf32>
    %3 = arith.mulf %2, %2 : vector<8x256xf32>
    %4 = vector.shape_cast %3 : vector<8x256xf32> to vector<1x8x256xf32>
    %cst = arith.constant dense<0.000000e+00> : vector<1xf32>
    %5 = vector.multi_reduction <add>, %4, %cst [1, 2] : vector<1x8x256xf32> to vector<1xf32>
    %6 = vector.shape_cast %5 : vector<1xf32> to vector<1x1x1xf32>
    %7 = vector.extract %6[0, 0, 0] : f32 from vector<1x1x1xf32>
    %c0_3 = arith.constant 0 : index
    %c0_4 = arith.constant 0 : index
    %8 = memref.load %arg4[%c0_3, %c0_4] : memref<1x1xf32, #tpu.memory_space<smem>>
    memref.store %7, %arg4[%c0_3, %c0_4] : memref<1x1xf32, #tpu.memory_space<smem>>
    return
  }
  func.func @transform_0(%arg0: i32) -> (i32, i32) {
    %c0_i32 = arith.constant 0 : i32
    %c0_i32_0 = arith.constant 0 : i32
    return %arg0, %c0_i32 : i32, i32
  }
  func.func @transform_1(%arg0: i32) -> (i32, i32) {
    %c0_i32 = arith.constant 0 : i32
    %c0_i32_0 = arith.constant 0 : i32
    return %arg0, %c0_i32 : i32, i32
  }
  func.func @transform_2(%arg0: i32) -> (i32, i32) {
    %c0_i32 = arith.constant 0 : i32
    %c0_i32_0 = arith.constant 0 : i32
    return %arg0, %c0_i32 : i32, i32
  }
  func.func @transform_3(%arg0: i32) -> (i32, i32) {
    %c0_i32 = arith.constant 0 : i32
    %c0_i32_0 = arith.constant 0 : i32
    return %arg0, %c0_i32 : i32, i32
  }
}

</mosaic_0001>

<bundles_post_ra>
// kernel: joints_mse_loss.1
= control target key start
LH: loop header
LB: loop body
LE: loop exit
PB: predicated region body
PF: predicated region fallthrough
CT: control target
= control target key end

     0   :  { %s108_s0 = inlined_call_operand.vmem [shape: f32[8,1], index: 0, kind: input, shape index: {}]   ;;  %s109_s1 = inlined_call_operand.vmem [shape: f32[8,256], index: 1, kind: input, shape index: {}]   ;;  %s110_s2 = inlined_call_operand.vmem [shape: f32[8,256], index: 2, kind: input, shape index: {}]   ;;  %s111_s3 = inlined_call_operand.hbm [shape: f32[1,1], index: 3, kind: output, shape index: {}]  }
   0x1   :  { %v15_v0 = vld [vmem:[%s109_s1] sm:$0xff]  ;;  %v16_v1 = vld [vmem:[%s109_s1 + $0x8] sm:$0xff] }
   0x2   :  { %v17_v2 = vld [vmem:[%s110_s2] sm:$0xff]  ;;  %v18_v3 = vld [vmem:[%s110_s2 + $0x8] sm:$0xff] }
   0x3   :  { %v19_v4 = vsub.f32 %v15_v0, %v17_v2 }
   0x4   :  { %8 = vsyncpa [#allocation3], 0  ;;  %v20_v5 = vsub.f32 %v16_v1, %v18_v3  ;;  %s51_s2 = scalar_lea.hbm %s111_s3, 16 }
   0x5   :  { %v21_v6 = vmul.f32 %v19_v4, %v19_v4  ;;  %p52_p0 = scmp.ne.s32.totalorder %s111_s3, %s51_s2  ;;  %p55_p1 = scmp.lt.u32.totalorder %s51_s2, %s111_s3 }
   0x6   :  { %v22_v7 = vmul.f32 %v20_v5, %v20_v5 }
   0x7   :  { %p57_p2 = pnand %p55_p1, %p52_p0 }
   0x8   :  { %v23_v8 = vadd.f32 %v22_v7, %v21_v6 }
   0xa   :  { %24 = vadd.xlane.f32.xlu0 %v23_v8 }
  0x97   :  { %v25_v9 = vpop.xlane.xlu0 %24 }
  0x98   :  { %v26_v10 = vrot.slane %v25_v9, 4 }
  0x9a   :  { %v27_v11 = vadd.f32 %v26_v10, %v25_v9 }
  0x9c   :  { %v28_v12 = vrot.slane %v27_v11, 2 }
  0x9e   :  { %v29_v13 = vadd.f32 %v28_v12, %v27_v11 }
  0xa0   :  { %v30_v14 = vrot.slane %v29_v13, 1 }
  0xa2   :  { %v31_v15 = vadd.f32 %v30_v14, %v29_v13 }
  0xa4   :  { %48 = vpush %v31_v15 }
  0xd5   :  { %s49_s1 = spop %48 }
  0xd6   :  { %34 = sst [smem:[#allocation2]] %s49_s1 }
  0xd7   :  { %60 = shalt.err (!%p57_p2)
}
  0xd8   :  { %s63_s25 = smov [#allocation2]  }
  0xd9   :  { %42 = dma.smem_to_hbm %s63_s25, 16, %s111_s3, [#allocation3]  }
  0xda   :  { %61 = dma.done.wait [#allocation3], 16  }
  0xdb   :  { %62 = vsyncadd [#allocation3], 4294967280 }
  0xdc   :  { %46 = sfence }
  0xdd   :  { %47 = vsyncpa [#allocation3], 1 }

</bundles_post_ra>
